<compile_context>
chip_gen: v6e
topology: v6e:2x2x1
jax: 0.10.0
libtpu: 0.0.40
codegen_flags: <defaults>
</compile_context>

<pallas_src>
import functools

import jax
import jax.numpy as jnp
from jax.experimental import pallas as pl
from jax.experimental.pallas import tpu as pltpu


def _laplacian_weight(in_channels: int) -> jnp.ndarray:
    """Deterministic replica of LaplacianConv.__init__'s registered buffer."""
    assert in_channels == 3, "buffer init `laplacian[0, :, 2] = 3x3` only broadcasts for C == 3"
    lap2d = jnp.array([[0.0, 1.0, 0.0],
                       [1.0, -4.0, 1.0],
                       [0.0, 1.0, 0.0]], dtype=jnp.float32)
    w = jnp.zeros((1, in_channels, 3, 3), dtype=jnp.float32)   # torch.empty -> zeros
    w = w.at[0, :, 2, :].set(lap2d)                            # exact init replica
    return w


def _round_up(v: int, m: int) -> int:
    return (v + m - 1) // m * m


def _lap_stencil_s2_kernel(cen_ref, ev_ref, o_ref):
    # cen_ref: (3, TH, Wo)   center-column taps (ki=2, kj=1) for channels 0,1,2
    # ev_ref : (TH, Wo + 1)  channel-1 even-column row; left = ev[:, :Wo],
    #                        right = ev[:, 1:Wo+1] (derived in-kernel).
    # 5 VPU FMAs per output vreg; weights baked in (1, 1, -4, 1, 1); f32 accum.
    wo = o_ref.shape[-1]
    c0 = cen_ref[0].astype(jnp.float32)
    c1 = cen_ref[1].astype(jnp.float32)
    c2 = cen_ref[2].astype(jnp.float32)
    ev = ev_ref[...].astype(jnp.float32)
    acc = (c0 + c2 - 4.0 * c1) + ev[:, :wo] + ev[:, 1:wo + 1]
    o_ref[...] = acc.astype(o_ref.dtype)


def _lap_stencil_gen_kernel(cen_ref, lft_ref, rgt_ref, o_ref):
    # Generic-stride fallback: left/right channel-1 taps arrive as planes.
    c0 = cen_ref[0].astype(jnp.float32)
    c1 = cen_ref[1].astype(jnp.float32)
    c2 = cen_ref[2].astype(jnp.float32)
    acc = (c0 + c2 - 4.0 * c1) \
        + lft_ref[...].astype(jnp.float32) + rgt_ref[...].astype(jnp.float32)
    o_ref[...] = acc.astype(o_ref.dtype)


def _choose_tile_h(ho: int, wo: int, n_batch: int, in_isz: int, out_isz: int) -> int:
    """Full-lane-width tiles; tile only the output-row axis."""
    # Bytes of one output-row's worth of kernel block data (inputs + output).
    row_bytes = (3 * wo + (wo + 1)) * in_isz + wo * out_isz
    budget = 12 * 1024 * 1024            # double-buffered working-set target
    th_cap = max(8, (budget // max(1, 2 * row_bytes)) // 8 * 8)
    th = min(256, th_cap)                # multiple of 8
    if ho <= th:
        th = ho                          # one full-height tile (block dim == array dim)
        if n_batch == 1 and ho >= 16:
            # Guarantee >= 2 parallel grid steps so both v7x TensorCores get work.
            th = _round_up(-(-ho // 2), 8)
    return th


@functools.partial(jax.jit, static_argnames=("in_channels", "stride", "padding"))
def laplacian_conv(x, *, in_channels, stride=2, padding=0):
    """Equivalent of LaplacianConv(in_channels, stride, padding).forward(x).

    Output dtype follows x.dtype (accumulation is f32 in-register).
    """
    N, C, H, W = x.shape
    assert C == in_channels == 3, "module only supports in_channels == 3"
    s = int(stride)
    p = int(padding)
    if p:
        x = jnp.pad(x, ((0, 0), (0, 0), (p, p), (p, p)))
        H += 2 * p
        W += 2 * p

    Ho = (H - 3) // s + 1
    Wo = (W - 3) // s + 1
    assert Ho >= 1 and Wo >= 1, "input too small for a 3x3 window"

    row_sl = slice(2, 2 + s * (Ho - 1) + 1, s)   # the only input rows ever read

    th = _choose_tile_h(Ho, Wo, N, x.dtype.itemsize, x.dtype.itemsize)
    grid = (N, pl.cdiv(Ho, th))
    cparams = pltpu.CompilerParams(
        dimension_semantics=("parallel", "parallel"),
        vmem_limit_bytes=32 * 1024 * 1024)

    out_shape = jax.ShapeDtypeStruct((N, 1, Ho, Wo), x.dtype)
    out_spec = pl.BlockSpec((None, None, th, Wo), lambda n, i: (n, 0, i, 0))
    cen_spec = pl.BlockSpec((None, 3, th, Wo), lambda n, i: (n, 0, i, 0))

    def plane_spec(width):
        return pl.BlockSpec((None, th, width), lambda n, i: (n, i, 0))

    # Center-column taps (ki=2, kj=1) for all three channels: (N, 3, Ho, Wo).
    cen = x[:, :, row_sl, 1:1 + s * (Wo - 1) + 1:s]

    if s == 2:
        # Channel-1 even columns 0,2,...,2*Wo -> one plane of width Wo+1;
        # left/right taps are derived in-kernel from lane-offset slices.
        ev = x[:, 1, row_sl, 0:2 * (Wo - 1) + 3:2]               # (N, Ho, Wo+1)
        return pl.pallas_call(
            _lap_stencil_s2_kernel,
            out_shape=out_shape,
            grid=grid,
            in_specs=[cen_spec, plane_spec(Wo + 1)],
            out_specs=out_spec,
            compiler_params=cparams,
        )(cen, ev)

    # Generic-stride fallback: separate left / right channel-1 tap planes.
    lft = x[:, 1, row_sl, 0:s * (Wo - 1) + 1:s]                  # (N, Ho, Wo)
    rgt = x[:, 1, row_sl, 2:2 + s * (Wo - 1) + 1:s]              # (N, Ho, Wo)
    return pl.pallas_call(
        _lap_stencil_gen_kernel,
        out_shape=out_shape,
        grid=grid,
        in_specs=[cen_spec, plane_spec(Wo), plane_spec(Wo)],
        out_specs=out_spec,
        compiler_params=cparams,
    )(cen, lft, rgt)


if __name__ == "__main__":
    key = jax.random.PRNGKey(0)
    N, C, H, W = 2, 3, 16, 16
    x = jax.random.normal(key, (N, C, H, W), dtype=jnp.float32)

    w = _laplacian_weight(C)   # deterministic replica of the torch buffer

    def ref(inp, stride, padding):
        return jax.lax.conv_general_dilated(
            inp, w, window_strides=(stride, stride),
            padding=((padding, padding), (padding, padding)),
            dimension_numbers=("NCHW", "OIHW", "NCHW"))

    # Module defaults: stride=2, padding=0 (fused even/odd fast path;
    # Ho=Wo=7 -> exercises the non-(8,128)-multiple masked-edge case).
    y = jax.block_until_ready(laplacian_conv(x, in_channels=C, stride=2, padding=0))
    assert y.shape == (N, 1, 7, 7), y.shape
    assert jnp.allclose(y, ref(x, 2, 0), atol=1e-5, rtol=1e-5), "mismatch (stride=2, padding=0)"

    # Padding path.
    y2 = jax.block_until_ready(laplacian_conv(x, in_channels=C, stride=2, padding=1))
    assert y2.shape == (N, 1, 8, 8), y2.shape
    assert jnp.allclose(y2, ref(x, 2, 1), atol=1e-5, rtol=1e-5), "mismatch (stride=2, padding=1)"

    # Generic-stride fallback path.
    y3 = jax.block_until_ready(laplacian_conv(x, in_channels=C, stride=3, padding=0))
    assert y3.shape == (N, 1, 5, 5), y3.shape
    assert jnp.allclose(y3, ref(x, 3, 0), atol=1e-5, rtol=1e-5), "mismatch (stride=3, padding=0)"

    print("KERNEL_OK")
</pallas_src>

<mosaic_0001>
module attributes {stable_mosaic.version = 11 : i64} {
  func.func @_lap_stencil_s2_kernel(%arg0: i32, %arg1: i32, %arg2: memref<1x3x7x7xf32, #tpu.memory_space<vmem>>, %arg3: memref<1x7x8xf32, #tpu.memory_space<vmem>>, %arg4: memref<1x1x7x7xf32, #tpu.memory_space<vmem>>) attributes {dimension_semantics = [#tpu.dimension_semantics<parallel>, #tpu.dimension_semantics<parallel>], iteration_bounds = array<i64: 2, 1>, scalar_prefetch = 0 : i64, scratch_operands = 0 : i64, tpu.core_type = #tpu.core_type<tc>, window_params = [{transform_indices = @transform_0, window_bounds = array<i64: 1, 3, 7, 7>}, {transform_indices = @transform_1, window_bounds = array<i64: 1, 7, 8>}, {transform_indices = @transform_2, window_bounds = array<i64: 1, 1, 7, 7>}]} {
    %c0 = arith.constant 0 : index
    %c0_0 = arith.constant 0 : index
    %c0_1 = arith.constant 0 : index
    %c0_2 = arith.constant 0 : index
    %0 = vector.load %arg2[%c0, %c0_0, %c0_1, %c0_2] : memref<1x3x7x7xf32, #tpu.memory_space<vmem>>, vector<1x1x7x7xf32>
    %1 = vector.shape_cast %0 : vector<1x1x7x7xf32> to vector<7x7xf32>
    %c0_3 = arith.constant 0 : index
    %c1 = arith.constant 1 : index
    %c0_4 = arith.constant 0 : index
    %c0_5 = arith.constant 0 : index
    %2 = vector.load %arg2[%c0_3, %c1, %c0_4, %c0_5] : memref<1x3x7x7xf32, #tpu.memory_space<vmem>>, vector<1x1x7x7xf32>
    %3 = vector.shape_cast %2 : vector<1x1x7x7xf32> to vector<7x7xf32>
    %c0_6 = arith.constant 0 : index
    %c2 = arith.constant 2 : index
    %c0_7 = arith.constant 0 : index
    %c0_8 = arith.constant 0 : index
    %4 = vector.load %arg2[%c0_6, %c2, %c0_7, %c0_8] : memref<1x3x7x7xf32, #tpu.memory_space<vmem>>, vector<1x1x7x7xf32>
    %5 = vector.shape_cast %4 : vector<1x1x7x7xf32> to vector<7x7xf32>
    %c0_9 = arith.constant 0 : index
    %c0_10 = arith.constant 0 : index
    %c0_11 = arith.constant 0 : index
    %6 = vector.load %arg3[%c0_9, %c0_10, %c0_11] : memref<1x7x8xf32, #tpu.memory_space<vmem>>, vector<1x7x8xf32>
    %7 = vector.shape_cast %6 : vector<1x7x8xf32> to vector<7x8xf32>
    %8 = arith.addf %1, %5 : vector<7x7xf32>
    %cst = arith.constant 4.000000e+00 : f32
    %9 = vector.broadcast %cst : f32 to vector<7x7xf32>
    %10 = arith.mulf %9, %3 : vector<7x7xf32>
    %11 = arith.subf %8, %10 : vector<7x7xf32>
    %12 = vector.extract_strided_slice %7 {offsets = [0, 0], sizes = [7, 7], strides = [1, 1]} : vector<7x8xf32> to vector<7x7xf32>
    %13 = arith.addf %11, %12 : vector<7x7xf32>
    %14 = vector.extract_strided_slice %7 {offsets = [0, 1], sizes = [7, 7], strides = [1, 1]} : vector<7x8xf32> to vector<7x7xf32>
    %15 = arith.addf %13, %14 : vector<7x7xf32>
    %c0_12 = arith.constant 0 : index
    %c0_13 = arith.constant 0 : index
    %c0_14 = arith.constant 0 : index
    %c0_15 = arith.constant 0 : index
    %16 = vector.load %arg4[%c0_12, %c0_13, %c0_14, %c0_15] : memref<1x1x7x7xf32, #tpu.memory_space<vmem>>, vector<1x1x7x7xf32>
    %17 = vector.shape_cast %16 : vector<1x1x7x7xf32> to vector<7x7xf32>
    %18 = vector.shape_cast %15 : vector<7x7xf32> to vector<1x1x7x7xf32>
    tpu.vector_store %arg4[%c0_12, %c0_13, %c0_14, %c0_15], %18 {strides = array<i32>} : memref<1x1x7x7xf32, #tpu.memory_space<vmem>>, vector<1x1x7x7xf32>,
    return
  }
  func.func @transform_0(%arg0: i32, %arg1: i32) -> (i32, i32, i32, i32) {
    %c0_i32 = arith.constant 0 : i32
    %c0_i32_0 = arith.constant 0 : i32
    %c0_i32_1 = arith.constant 0 : i32
    return %arg0, %c0_i32, %arg1, %c0_i32_0 : i32, i32, i32, i32
  }
  func.func @transform_1(%arg0: i32, %arg1: i32) -> (i32, i32, i32) {
    %c0_i32 = arith.constant 0 : i32
    %c0_i32_0 = arith.constant 0 : i32
    return %arg0, %arg1, %c0_i32 : i32, i32, i32
  }
  func.func @transform_2(%arg0: i32, %arg1: i32) -> (i32, i32, i32, i32) {
    %c0_i32 = arith.constant 0 : i32
    %c0_i32_0 = arith.constant 0 : i32
    %c0_i32_1 = arith.constant 0 : i32
    return %arg0, %c0_i32, %arg1, %c0_i32_0 : i32, i32, i32, i32
  }
}

</mosaic_0001>

<bundles_post_ra>
// kernel: laplacian_conv.1
= control target key start
LH: loop header
LB: loop body
LE: loop exit
PB: predicated region body
PF: predicated region fallthrough
CT: control target
= control target key end

     0   :  { %s388_s9 = smov 0   ;;  %s390_s10 = smov 0   ;;  %s421_s0 = inlined_call_operand.vmem [shape: f32[2,3,7,7], index: 0, kind: input, shape index: {}]   ;;  %s422_s1 = inlined_call_operand.vmem [shape: f32[2,7,8], index: 1, kind: input, shape index: {}]   ;;  %s423_s2 = inlined_call_operand.vmem [shape: f32[2,1,7,7], index: 2, kind: output, shape index: {}]  }
   0x1   :  { %s392_s11 = smov 0  }
   0x2 LB: > { %s24_s12 = sadd.s32 1, %s366_s10  ;;  %p314_p0 = scmp.ge.s32.totalorder %s370_s11, 1  ;;  %s370_s11 = sphi %s392_s11, %s12_s11   ;;  %s366_s10 = sphi %s390_s10, %s425_s10   ;;  %s362_s9 = sphi %s388_s9, %s424_s9  }
   0x3   : > { %p26_p1 = scmp.ge.s32.totalorder %s24_s12, 2  ;;  %p145_p2 = scmp.lt.s32.totalorder %s370_s11, 3 }
   0x5   : > { %s427_s12 = smov (%p26_p1, %s24_s12), 0  ;;  %p146_p3 = pnand %p314_p0, %p145_p2 }
   0x6   : > { %p179_p4 = scmp.lt.s32.totalorder (!%p146_p3), %s362_s9, 1  ;;  %s372_s21 = smov (!%p146_p3), 127  }
   0x7   : > { %149 = sbr.rel (%p146_p3) target bundleno = 134 (0x86), region = 28 }
   0xc   : > { %s429_s9 = smov (!%p179_p4, %s362_s9), 1  ;;  %vm216_vm0 = vcmask 55296  }
   0xd   : > { %s322_s13 = smul.u32 24, %s429_s9  ;;  %s316_s14 = sshll.u32 %s429_s9, 3 }
   0xe   : > { %s193_s17 = scalar_lea.vmem %s422_s1, %s316_s14  ;;  %s200_s24 = scalar_lea.vmem %s423_s2, %s316_s14 }
   0xf   : > { %s186_s20 = scalar_lea.vmem %s421_s0, %s322_s13  ;;  %v206_v0 = vld [vmem:[%s193_s17] sm:$0x7f] }
  0x10   : > { %v201_v1 = vld [vmem:[%s186_s20] sm:$0x7f]  ;;  %v318_v2 = vld [vmem:[%s186_s20 + $0x8] sm:$0x7f]  ;;  %v319_v3 = vld [vmem:[%s186_s20 + $0x10] sm:$0x7f]  ;;  %212 = vrot.lane.b32.xlu0 %v206_v0, %s372_s21 }
  0x11   : > { %v207_v4 = vadd.f32 %v319_v3, %v201_v1  ;;  %v208_v5 = vmul.f32 4.0, %v318_v2 }
  0x13   : > { %v209_v6 = vsub.f32 %v207_v4, %v208_v5 }
  0x15   : > { %v210_v7 = vadd.f32 %v209_v6, %v206_v0 }
  0x82   : > { %v213_v8 = vpop.permute.xlu0 %212 }
  0x83   : > { %v215_v9 = vadd.f32 %v213_v8, %v210_v7 }
  0x85   : > { %217 = vst.msk [vmem:[%s200_s24] sm:$0x7f] %vm216_vm0, %v215_v9 }
  0x86 PF: > { %s12_s11 = sadd.s32 1, %s370_s11   ;;  %s424_s9 = smov %s366_s10 }
  0x87   : > { %p9_p5 = scmp.ge.s32.totalorder %s12_s11, 4   ;;  %s425_s10 = smov %s427_s12 }
  0x89   :  { %11 = sbr.rel (!%p9_p5) target bundleno = 2 (0x2), region = 63 }

</bundles_post_ra>
